<compile_context>
chip_gen: v7x
topology: tpu7x:2x2x1
jax: 0.10.0
libtpu: 0.0.40
codegen_flags: <defaults>
</compile_context>

<pallas_src>
import functools

import jax
import jax.numpy as jnp
from jax.experimental import pallas as pl
from jax.experimental.pallas import tpu as pltpu

_EPS = 1e-5
_MIN_GRID_BLOCKS = 8        # keep both v7x TensorCores fed; free on 1-TC chips


def _sublane_tile(dtype):
    # sublane packing: f32 -> 8, bf16 -> 16, int8/fp8 -> 32
    return 8 * max(1, 4 // jnp.dtype(dtype).itemsize)


def _vmem_budget():
    """Generation-aware (vmem_limit_bytes, target_input_block_bytes)."""
    try:
        cap = int(pltpu.get_tpu_info().vmem_capacity_bytes)
    except Exception:
        try:
            kind = jax.devices()[0].device_kind.lower()
            big = any(t in kind for t in ("v4", "v5", "v6"))
            cap = (128 if big else 64) * 1024 * 1024
        except Exception:
            cap = 64 * 1024 * 1024          # conservative (v7x-sized)
    # Scoped limit: ~55% of physical VMEM (~35 MiB on v7x, ~70 MiB on v5e/v6e).
    limit = min(int(cap * 0.55), 96 * 1024 * 1024)
    # Per-block budget: 2x double-buffered (in + out) blocks plus ~3 f32
    # temporaries of the block -> divide by 12 (safe for f32 and bf16 inputs).
    target = max(512 * 1024, min(limit // 12, 8 * 1024 * 1024))
    return limit, target


_VMEM_LIMIT_BYTES, _TARGET_BLOCK_BYTES = _vmem_budget()


# ---------------------------------------------------------------------------
# 4-D (NCHW) hot path: channels on sublanes, H*W (lane-dense) on lanes.
# Each lane column is one spatial location; reducing over the channel
# (sublane) axis == LayerNorm over channels == to_4d(LN(to_3d(x))).
# ---------------------------------------------------------------------------
def _ln_nchw_withbias_kernel(x_ref, w_ref, b_ref, o_ref):
    x = x_ref[...].astype(jnp.float32)               # (1, C, T)
    mu = jnp.mean(x, axis=1, keepdims=True)          # (1, 1, T)
    d = x - mu
    var = jnp.mean(d * d, axis=1, keepdims=True)     # biased variance
    y = d * jax.lax.rsqrt(var + _EPS)                # rsqrt -> EUP
    w = w_ref[...].astype(jnp.float32)               # (1, C, 1)
    b = b_ref[...].astype(jnp.float32)               # (1, C, 1)
    o_ref[...] = (y * w + b).astype(o_ref.dtype)


def _ln_nchw_biasfree_kernel(x_ref, w_ref, o_ref):
    x = x_ref[...].astype(jnp.float32)               # (1, C, T)
    mu = jnp.mean(x, axis=1, keepdims=True)
    ex2 = jnp.mean(x * x, axis=1, keepdims=True)
    var = ex2 - mu * mu                              # biased var, no centered temp
    y = x * jax.lax.rsqrt(var + _EPS)                # x is NOT mean-centered
    o_ref[...] = (y * w_ref[...].astype(jnp.float32)).astype(o_ref.dtype)


def _layernorm_nchw(x, weight, bias, layernorm_type):
    b, c, h, w = x.shape
    hw = h * w
    itemsize = jnp.dtype(x.dtype).itemsize
    sub = _sublane_tile(x.dtype)
    c_pad = pl.cdiv(c, sub) * sub                    # padded sublane footprint

    # Lane-dense tile along H*W sized from the padded per-column VMEM bytes.
    t_hw = _TARGET_BLOCK_BYTES // max(1, c_pad * itemsize)
    t_hw = max(128, (t_hw // 128) * 128)
    # Keep >= _MIN_GRID_BLOCKS blocks in the grid so v7x's two TCs both work.
    tiles_wanted = pl.cdiv(_MIN_GRID_BLOCKS, b)
    t_hw = min(t_hw, max(128, pl.cdiv(pl.cdiv(hw, tiles_wanted), 128) * 128))
    if t_hw >= hw:
        t_hw = hw                                    # full extent: always legal
    grid = (b, pl.cdiv(hw, t_hw))                    # ragged edge: no jnp.pad

    x3 = x.reshape(b, c, hw)                         # free (contiguous) reshape
    w3 = weight.reshape(1, c, 1)

    x_spec = pl.BlockSpec((1, c, t_hw), lambda bi, ti: (bi, 0, ti))
    p_spec = pl.BlockSpec((1, c, 1), lambda bi, ti: (0, 0, 0))
    o_spec = pl.BlockSpec((1, c, t_hw), lambda bi, ti: (bi, 0, ti))

    cparams = pltpu.CompilerParams(
        dimension_semantics=("parallel", "parallel"),
        vmem_limit_bytes=_VMEM_LIMIT_BYTES,
    )
    n_elem = b * c * hw
    cost = pl.CostEstimate(flops=8 * n_elem, transcendentals=b * hw,
                           bytes_accessed=2 * n_elem * itemsize)

    if layernorm_type == "BiasFree":
        kernel = _ln_nchw_biasfree_kernel
        ins, in_specs = (x3, w3), [x_spec, p_spec]
    else:
        kernel = _ln_nchw_withbias_kernel
        ins, in_specs = (x3, w3, bias.reshape(1, c, 1)), [x_spec, p_spec, p_spec]

    y3 = pl.pallas_call(
        kernel,
        out_shape=jax.ShapeDtypeStruct((b, c, hw), x.dtype),
        grid_spec=pltpu.PrefetchScalarGridSpec(
            num_scalar_prefetch=0, grid=grid,
            in_specs=in_specs, out_specs=o_spec),
        compiler_params=cparams,
        cost_estimate=cost,
    )(*ins)
    return y3.reshape(b, c, h, w)


# ---------------------------------------------------------------------------
# 3-D path (x already 'b l c'), generic fallback: row-tiled, C on lanes.
# ---------------------------------------------------------------------------
def _ln_rows_withbias_kernel(x_ref, w_ref, b_ref, o_ref):
    x = x_ref[...].astype(jnp.float32)               # (TM, C)
    mu = jnp.mean(x, axis=-1, keepdims=True)
    d = x - mu
    var = jnp.mean(d * d, axis=-1, keepdims=True)    # biased variance
    y = d * jax.lax.rsqrt(var + _EPS)
    o_ref[...] = (y * w_ref[...].astype(jnp.float32)
                  + b_ref[...].astype(jnp.float32)).astype(o_ref.dtype)


def _ln_rows_biasfree_kernel(x_ref, w_ref, o_ref):
    x = x_ref[...].astype(jnp.float32)               # (TM, C)
    mu = jnp.mean(x, axis=-1, keepdims=True)
    ex2 = jnp.mean(x * x, axis=-1, keepdims=True)
    var = ex2 - mu * mu
    y = x * jax.lax.rsqrt(var + _EPS)
    o_ref[...] = (y * w_ref[...].astype(jnp.float32)).astype(o_ref.dtype)


def _layernorm_rows_simple(x2d, weight, bias, layernorm_type):
    n, c = x2d.shape
    itemsize = jnp.dtype(x2d.dtype).itemsize
    sub = _sublane_tile(x2d.dtype)
    row_bytes = pl.cdiv(c, 128) * 128 * itemsize     # padded lane footprint

    tm = max(sub, (_TARGET_BLOCK_BYTES // row_bytes) // sub * sub)
    tm = min(tm, max(sub, pl.cdiv(pl.cdiv(n, _MIN_GRID_BLOCKS), sub) * sub))
    if tm >= n:
        tm = n                                       # full extent: always legal
    grid = (pl.cdiv(n, tm),)                         # ragged edge: no jnp.pad

    x_spec = pl.BlockSpec((tm, c), lambda i: (i, 0))
    p_spec = pl.BlockSpec((1, c), lambda i: (0, 0))
    o_spec = pl.BlockSpec((tm, c), lambda i: (i, 0))
    cparams = pltpu.CompilerParams(
        dimension_semantics=("parallel",), vmem_limit_bytes=_VMEM_LIMIT_BYTES)
    cost = pl.CostEstimate(flops=8 * n * c, transcendentals=n,
                           bytes_accessed=2 * n * c * itemsize)

    w2 = weight.reshape(1, c)
    if layernorm_type == "BiasFree":
        kernel = _ln_rows_biasfree_kernel
        ins, in_specs = (x2d, w2), [x_spec, p_spec]
    else:
        kernel = _ln_rows_withbias_kernel
        ins, in_specs = (x2d, w2, bias.reshape(1, c)), [x_spec, p_spec, p_spec]

    return pl.pallas_call(
        kernel,
        out_shape=jax.ShapeDtypeStruct((n, c), x2d.dtype),
        grid_spec=pltpu.PrefetchScalarGridSpec(
            num_scalar_prefetch=0, grid=grid,
            in_specs=in_specs, out_specs=o_spec),
        compiler_params=cparams,
        cost_estimate=cost,
    )(*ins)


# ---------------------------------------------------------------------------
# 3-D path, small C (C < 128, 128 % C == 0): pack k = 128 // C rows per
# 128-wide lane row (free reshape) so every load / store is lane-dense.
# Per-segment mean/var are computed with a block-diagonal 0/1 matrix on the
# otherwise-idle MXU (precision=HIGHEST keeps it effectively exact f32),
# which also broadcasts the result back to every lane of the segment.
# ---------------------------------------------------------------------------
def _ln_packed_withbias_kernel(c, x_ref, seg_ref, w_ref, b_ref, o_ref):
    inv_c = 1.0 / c
    x = x_ref[...].astype(jnp.float32)               # (TM, P), P = k*C lanes
    seg = seg_ref[...]                               # (P, P) block-diag of ones
    dot = functools.partial(jnp.dot, preferred_element_type=jnp.float32,
                            precision=jax.lax.Precision.HIGHEST)
    mu = dot(x, seg) * inv_c                         # segment mean, broadcast
    d = x - mu
    var = dot(d * d, seg) * inv_c                    # biased variance
    y = d * jax.lax.rsqrt(var + _EPS)
    o_ref[...] = (y * w_ref[...].astype(jnp.float32)
                  + b_ref[...].astype(jnp.float32)).astype(o_ref.dtype)


def _ln_packed_biasfree_kernel(c, x_ref, seg_ref, w_ref, o_ref):
    inv_c = 1.0 / c
    x = x_ref[...].astype(jnp.float32)
    seg = seg_ref[...]
    dot = functools.partial(jnp.dot, preferred_element_type=jnp.float32,
                            precision=jax.lax.Precision.HIGHEST)
    mu = dot(x, seg) * inv_c
    ex2 = dot(x * x, seg) * inv_c
    var = ex2 - mu * mu
    y = x * jax.lax.rsqrt(var + _EPS)
    o_ref[...] = (y * w_ref[...].astype(jnp.float32)).astype(o_ref.dtype)


def _layernorm_rows_packed(x2d, weight, bias, layernorm_type, k):
    n, c = x2d.shape
    p = k * c                                        # = 128 (lane-dense)
    rows = n // k
    xp = x2d.reshape(rows, p)                        # free: contiguous regroup
    itemsize = jnp.dtype(x2d.dtype).itemsize
    sub = _sublane_tile(x2d.dtype)

    tm = max(sub, (_TARGET_BLOCK_BYTES // (p * itemsize)) // sub * sub)
    tm = min(tm, max(sub, pl.cdiv(pl.cdiv(rows, _MIN_GRID_BLOCKS), sub) * sub))
    if tm >= rows:
        tm = rows
    grid = (pl.cdiv(rows, tm),)

    idx = jnp.arange(p) // c
    seg = (idx[:, None] == idx[None, :]).astype(jnp.float32)   # (P, P)
    w_t = jnp.tile(weight.reshape(1, c), (1, k))               # (1, P)

    x_spec = pl.BlockSpec((tm, p), lambda i: (i, 0))
    s_spec = pl.BlockSpec((p, p), lambda i: (0, 0))
    v_spec = pl.BlockSpec((1, p), lambda i: (0, 0))
    o_spec = pl.BlockSpec((tm, p), lambda i: (i, 0))
    cparams = pltpu.CompilerParams(
        dimension_semantics=("parallel",), vmem_limit_bytes=_VMEM_LIMIT_BYTES)
    cost = pl.CostEstimate(flops=(8 + 4 * p) * n * c, transcendentals=n,
                           bytes_accessed=2 * n * c * itemsize)

    if layernorm_type == "BiasFree":
        kernel = functools.partial(_ln_packed_biasfree_kernel, c)
        ins, in_specs = (xp, seg, w_t), [x_spec, s_spec, v_spec]
    else:
        b_t = jnp.tile(bias.reshape(1, c), (1, k))
        kernel = functools.partial(_ln_packed_withbias_kernel, c)
        ins, in_specs = (xp, seg, w_t, b_t), [x_spec, s_spec, v_spec, v_spec]

    yp = pl.pallas_call(
        kernel,
        out_shape=jax.ShapeDtypeStruct((rows, p), x2d.dtype),
        grid_spec=pltpu.PrefetchScalarGridSpec(
            num_scalar_prefetch=0, grid=grid,
            in_specs=in_specs, out_specs=o_spec),
        compiler_params=cparams,
        cost_estimate=cost,
    )(*ins)
    return yp.reshape(n, c)


def _layernorm_rows(x2d, weight, bias, layernorm_type):
    n, c = x2d.shape
    if c < 128 and 128 % c == 0 and n % (128 // c) == 0:
        return _layernorm_rows_packed(x2d, weight, bias, layernorm_type, 128 // c)
    return _layernorm_rows_simple(x2d, weight, bias, layernorm_type)


@functools.partial(jax.jit, static_argnames=("layernorm_type",))
def layernorm_mamba(x, weight, bias, *, layernorm_type="WithBias"):
    """Forward of LayerNorm_mamba.

    x: (B, C, H, W) NCHW (like the PyTorch module), or (B, L, C).
    weight: (C,), bias: (C,) (ignored for BiasFree).
    """
    if x.ndim == 4:
        return _layernorm_nchw(x, weight, bias, layernorm_type)
    b, l, c = x.shape
    y2 = _layernorm_rows(x.reshape(b * l, c), weight, bias, layernorm_type)
    return y2.reshape(b, l, c)


# ---------------------------------------------------------------------------
# Pure-JAX reference mirroring the PyTorch module.
# ---------------------------------------------------------------------------
def _reference(x, weight, bias, layernorm_type):
    if x.ndim == 4:
        b, c, h, w = x.shape
        x3 = jnp.transpose(x, (0, 2, 3, 1)).reshape(b, h * w, c)
    else:
        x3 = x
    mu = jnp.mean(x3, axis=-1, keepdims=True)
    var = jnp.mean((x3 - mu) ** 2, axis=-1, keepdims=True)
    if layernorm_type == "BiasFree":
        y3 = x3 / jnp.sqrt(var + _EPS) * weight
    else:
        y3 = (x3 - mu) / jnp.sqrt(var + _EPS) * weight + bias
    if x.ndim == 4:
        return jnp.transpose(y3.reshape(b, h, w, c), (0, 3, 1, 2))
    return y3


if __name__ == "__main__":
    key = jax.random.PRNGKey(0)
    ok = True

    def _check(x, ln_type, sub_key):
        global ok
        c = x.shape[1] if x.ndim == 4 else x.shape[-1]
        kw, kb = jax.random.split(sub_key)
        weight = 1.0 + 0.1 * jax.random.normal(kw, (c,), dtype=jnp.float32)
        bias = 0.1 * jax.random.normal(kb, (c,), dtype=jnp.float32)
        out = jax.block_until_ready(
            layernorm_mamba(x, weight, bias, layernorm_type=ln_type))
        ref = _reference(x, weight, bias, ln_type)
        good = out.shape == x.shape and bool(
            jnp.allclose(out, ref, atol=1e-5, rtol=1e-5))
        ok = ok and good

    keys = jax.random.split(key, 16)

    # 4D NCHW path (primary): H*W multiple of 128, both variants.
    x4 = jax.random.normal(keys[0], (2, 4, 16, 16), dtype=jnp.float32)
    _check(x4, "WithBias", keys[1])
    _check(x4, "BiasFree", keys[2])

    # 4D NCHW, H*W < 128 (single full-extent block).
    x4b = jax.random.normal(keys[3], (2, 4, 10, 10), dtype=jnp.float32)
    _check(x4b, "WithBias", keys[4])

    # 4D NCHW, ragged lane tiles (H*W = 144, tile 128 -> clipped edge block).
    x4c = jax.random.normal(keys[5], (2, 4, 12, 12), dtype=jnp.float32)
    _check(x4c, "BiasFree", keys[6])

    # 3D path with C < 128 -> lane-packed MXU-segment kernel.
    x3 = jax.random.normal(keys[7], (2, 8, 32), dtype=jnp.float32)
    _check(x3, "WithBias", keys[8])
    _check(x3, "BiasFree", keys[9])

    # 3D path, C not a divisor of 128 -> generic rows fallback.
    x3b = jax.random.normal(keys[10], (2, 8, 48), dtype=jnp.float32)
    _check(x3b, "WithBias", keys[11])

    if ok:
        print("KERNEL_OK")
</pallas_src>

<mosaic_0001>
module attributes {stable_mosaic.version = 11 : i64} {
  func.func @_ln_nchw_withbias_kernel(%arg0: i32, %arg1: i32, %arg2: memref<1x4x128xf32, #tpu.memory_space<vmem>>, %arg3: memref<1x4x1xf32, #tpu.memory_space<vmem>>, %arg4: memref<1x4x1xf32, #tpu.memory_space<vmem>>, %arg5: memref<1x4x128xf32, #tpu.memory_space<vmem>>) attributes {dimension_semantics = [#tpu.dimension_semantics<parallel>, #tpu.dimension_semantics<parallel>], iteration_bounds = array<i64: 2, 2>, scalar_prefetch = 0 : i64, scratch_operands = 0 : i64, tpu.core_type = #tpu.core_type<tc>, window_params = [{transform_indices = @transform_0, window_bounds = array<i64: 1, 4, 128>}, {pipeline_mode = #tpu.pipeline_mode<synchronous>, transform_indices = @transform_1, window_bounds = array<i64: 1, 4, 1>}, {pipeline_mode = #tpu.pipeline_mode<synchronous>, transform_indices = @transform_2, window_bounds = array<i64: 1, 4, 1>}, {transform_indices = @transform_3, window_bounds = array<i64: 1, 4, 128>}]} {
    %c0 = arith.constant 0 : index
    %c0_0 = arith.constant 0 : index
    %c0_1 = arith.constant 0 : index
    %0 = vector.load %arg2[%c0, %c0_0, %c0_1] : memref<1x4x128xf32, #tpu.memory_space<vmem>>, vector<1x4x128xf32>
    %cst = arith.constant dense<0.000000e+00> : vector<1x128xf32>
    %1 = vector.multi_reduction <add>, %0, %cst [1] : vector<1x4x128xf32> to vector<1x128xf32>
    %2 = vector.shape_cast %1 : vector<1x128xf32> to vector<1x1x128xf32>
    %cst_2 = arith.constant 4.000000e+00 : f32
    %3 = vector.broadcast %cst_2 : f32 to vector<1x1x128xf32>
    %4 = arith.divf %2, %3 : vector<1x1x128xf32>
    %5 = vector.broadcast %4 : vector<1x1x128xf32> to vector<1x4x128xf32>
    %6 = arith.subf %0, %5 : vector<1x4x128xf32>
    %7 = arith.mulf %6, %6 : vector<1x4x128xf32>
    %cst_3 = arith.constant dense<0.000000e+00> : vector<1x128xf32>
    %8 = vector.multi_reduction <add>, %7, %cst_3 [1] : vector<1x4x128xf32> to vector<1x128xf32>
    %9 = vector.shape_cast %8 : vector<1x128xf32> to vector<1x1x128xf32>
    %cst_4 = arith.constant 4.000000e+00 : f32
    %10 = vector.broadcast %cst_4 : f32 to vector<1x1x128xf32>
    %11 = arith.divf %9, %10 : vector<1x1x128xf32>
    %cst_5 = arith.constant 9.99999974E-6 : f32
    %12 = vector.broadcast %cst_5 : f32 to vector<1x1x128xf32>
    %13 = arith.addf %11, %12 : vector<1x1x128xf32>
    %14 = math.rsqrt %13 : vector<1x1x128xf32>
    %15 = vector.broadcast %14 : vector<1x1x128xf32> to vector<1x4x128xf32>
    %16 = arith.mulf %6, %15 : vector<1x4x128xf32>
    %c0_6 = arith.constant 0 : index
    %c0_7 = arith.constant 0 : index
    %c0_8 = arith.constant 0 : index
    %17 = vector.load %arg3[%c0_6, %c0_7, %c0_8] : memref<1x4x1xf32, #tpu.memory_space<vmem>>, vector<1x4x1xf32>
    %c0_9 = arith.constant 0 : index
    %c0_10 = arith.constant 0 : index
    %c0_11 = arith.constant 0 : index
    %18 = vector.load %arg4[%c0_9, %c0_10, %c0_11] : memref<1x4x1xf32, #tpu.memory_space<vmem>>, vector<1x4x1xf32>
    %19 = vector.broadcast %17 : vector<1x4x1xf32> to vector<1x4x128xf32>
    %20 = arith.mulf %16, %19 : vector<1x4x128xf32>
    %21 = vector.broadcast %18 : vector<1x4x1xf32> to vector<1x4x128xf32>
    %22 = arith.addf %20, %21 : vector<1x4x128xf32>
    %c0_12 = arith.constant 0 : index
    %c0_13 = arith.constant 0 : index
    %c0_14 = arith.constant 0 : index
    %23 = vector.load %arg5[%c0_12, %c0_13, %c0_14] : memref<1x4x128xf32, #tpu.memory_space<vmem>>, vector<1x4x128xf32>
    tpu.vector_store %arg5[%c0_12, %c0_13, %c0_14], %22 {strides = array<i32>} : memref<1x4x128xf32, #tpu.memory_space<vmem>>, vector<1x4x128xf32>,
    return
  }
  func.func @transform_0(%arg0: i32, %arg1: i32) -> (i32, i32, i32) {
    %c0_i32 = arith.constant 0 : i32
    %c0_i32_0 = arith.constant 0 : i32
    return %arg0, %c0_i32, %arg1 : i32, i32, i32
  }
  func.func @transform_1(%arg0: i32, %arg1: i32) -> (i32, i32, i32) {
    %c0_i32 = arith.constant 0 : i32
    %c0_i32_0 = arith.constant 0 : i32
    %c0_i32_1 = arith.constant 0 : i32
    %c0_i32_2 = arith.constant 0 : i32
    return %c0_i32, %c0_i32_0, %c0_i32_1 : i32, i32, i32
  }
  func.func @transform_2(%arg0: i32, %arg1: i32) -> (i32, i32, i32) {
    %c0_i32 = arith.constant 0 : i32
    %c0_i32_0 = arith.constant 0 : i32
    %c0_i32_1 = arith.constant 0 : i32
    %c0_i32_2 = arith.constant 0 : i32
    return %c0_i32, %c0_i32_0, %c0_i32_1 : i32, i32, i32
  }
  func.func @transform_3(%arg0: i32, %arg1: i32) -> (i32, i32, i32) {
    %c0_i32 = arith.constant 0 : i32
    %c0_i32_0 = arith.constant 0 : i32
    return %arg0, %c0_i32, %arg1 : i32, i32, i32
  }
}

</mosaic_0001>

<bundles_post_ra>
// kernel: layernorm_mamba.1
= control target key start
LH: loop header
LB: loop body
LE: loop exit
PB: predicated region body
PF: predicated region fallthrough
CT: control target
= control target key end

     0   :  { %s443_s12 = smov 0   ;;  %s445_s13 = smov 0   ;;  %s507_s0 = inlined_call_operand.vmem [shape: f32[2,4,256], index: 0, kind: input, shape index: {}]   ;;  %s508_s1 = inlined_call_operand.vmem [shape: f32[1,4,1], index: 1, kind: input, shape index: {}]   ;;  %s509_s2 = inlined_call_operand.vmem [shape: f32[1,4,1], index: 2, kind: input, shape index: {}]   ;;  %s510_s3 = inlined_call_operand.vmem [shape: f32[2,4,256], index: 3, kind: output, shape index: {}]  }
   0x1   :  { %s447_s14 = smov 0   ;;  %s449_s15 = smov 0  }
   0x2   :  { %s451_s16 = smov 0  }
   0x3 LB: > { %s22_s17 = sadd.s32 1, %s412_s14  ;;  %s25_s18 = sadd.s32 1, %s416_s15  ;;  %s420_s16 = sphi %s451_s16, %s13_s16   ;;  %s416_s15 = sphi %s449_s15, %s514_s15   ;;  %s412_s14 = sphi %s447_s14, %s513_s14   ;;  %s408_s13 = sphi %s445_s13, %s512_s13   ;;  %s404_s12 = sphi %s443_s12, %s511_s12  }
   0x4   : > { %p23_p0 = scmp.ge.s32.totalorder %s22_s17, 2  ;;  %p331_p1 = scmp.ge.s32.totalorder %s420_s16, 1 }
   0x5   : > { %p156_p2 = scmp.lt.s32.totalorder %s420_s16, 5 }
   0x6   : > { %s516_s17 = smov (%p23_p0, %s22_s17), 0  ;;  %s518_s18 = smov (!%p23_p0, %s25_s18), %s416_s15 }
   0x7   : > { %p157_p3 = pnand %p331_p1, %p156_p2  ;;  %p27_p4 = scmp.ge.s32.totalorder %s518_s18, 2 }
   0x8   : > { %v226_v0 = vld [vmem:[%s508_s1] sm:$0xf] (!%p157_p3)  ;;  %v422_v1 = vmov (!%p157_p3), 0   ;;  %p186_p5 = scmp.lt.s32.totalorder (!%p157_p3), %s408_s13, 1  ;;  %p188_p6 = scmp.lt.s32.totalorder (!%p157_p3), %s404_s12, 1  ;;  %vm203_vm0 = vcmask (!%p157_p3), 1043456  }
   0x9   : > { %s520_s18 = smov (%p27_p4, %s518_s18), 0  ;;  %160 = sbr.rel (%p157_p3) target bundleno = 146 (0x92), region = 32 }
   0xa   : > { %379 = vset.pattern.permute.xlu0 (!%p157_p3), %v422_v1  ;;  %v227_v2 = vld [vmem:[%s509_s2] sm:$0xf] (!%p157_p3) }
   0xb   : > { %230 = vperm.xlu0 (!%p157_p3), %379, %v226_v0  }
   0xf   : > { %236 = vperm.xlu0 (!%p157_p3), %379, %v227_v2  }
  0x10   : > { %s522_s13 = smov (!%p186_p5, %s408_s13), 1  ;;  %s524_s12 = smov (!%p188_p6, %s404_s12), 1 }
  0x11   : > { %s332_s23 = sshll.u32 %s522_s13, 1 }
  0x12   : > { %s479_s24 = sadd.s32 %s332_s23, %s524_s12 }
  0x13   : > { %s333_s25 = sshll.u32 %s479_s24, 2 }
  0x14   : > { %s193_s28 = scalar_lea.vmem %s507_s0, %s333_s25  ;;  %s201_s4 = scalar_lea.vmem %s510_s3, %s333_s25 }
  0x15   : > { %v202_v3 = vld [vmem:[%s193_s28] sm:$0xf] }
  0x16   : > { %v204_v4 = vsel %vm203_vm0, %v202_v3, 0.0 }
  0x17   : > { %v205_v5 = vrot.slane %v204_v4, 4 }
  0x19   : > { %v206_v6 = vadd.f32 %v205_v5, %v204_v4 }
  0x1b   : > { %v207_v7 = vrot.slane %v206_v6, 2 }
  0x1d   : > { %v208_v8 = vadd.f32 %v207_v7, %v206_v6 }
  0x1f   : > { %v209_v9 = vrot.slane %v208_v8, 1 }
  0x21   : > { %v210_v10 = vadd.f32 %v209_v9, %v208_v8 }
  0x23   : > { %v212_v11 = vmul.f32 0.25, %v210_v10 }
  0x25   : > { %v213_v12 = vsub.f32 %v202_v3, %v212_v11 }
  0x27   : > { %v214_v13 = vmul.f32 %v213_v12, %v213_v12 }
  0x29   : > { %v215_v14 = vsel %vm203_vm0, %v214_v13, 0.0 }
  0x2a   : > { %v216_v15 = vrot.slane %v215_v14, 4 }
  0x2c   : > { %v217_v16 = vadd.f32 %v216_v15, %v215_v14 }
  0x2e   : > { %v218_v17 = vrot.slane %v217_v16, 2 }
  0x30   : > { %v219_v18 = vadd.f32 %v218_v17, %v217_v16 }
  0x32   : > { %v220_v19 = vrot.slane %v219_v18, 1 }
  0x34   : > { %v221_v20 = vadd.f32 %v220_v19, %v219_v18 }
  0x36   : > { %v222_v21 = vmul.f32 0.25, %v221_v20 }
  0x38   : > { %v223_v22 = vadd.f32 1e-05, %v222_v21 }
  0x3a   : > { %380 = vrsqrt.f32 %v223_v22 }
  0x44   : > { %v381_v23 = vpop.eup %380 }
  0x45   : > { %v225_v24 = vmul.f32 %v381_v23, %v213_v12 }
  0x8a   : > { %v231_v25 = vpop.permute.xlu0 %230 }
  0x8b   : > { %v233_v26 = vmul.f32 %v231_v25, %v225_v24 }
  0x8e   : > { %v237_v27 = vpop.permute.xlu0 %236 }
  0x8f   : > { %v239_v28 = vadd.f32 %v237_v27, %v233_v26 }
  0x91   : > { %240 = vst [vmem:[%s201_s4] sm:$0xf] %v239_v28 }
  0x92 PF: > { %s13_s16 = sadd.s32 1, %s420_s16   ;;  %s511_s12 = smov %s412_s14 }
  0x93   : > { %p10_p7 = scmp.ge.s32.totalorder %s13_s16, 6   ;;  %s512_s13 = smov %s416_s15 }
  0x94   : > { %s513_s14 = smov %s516_s17  ;;  %s514_s15 = smov %s520_s18 }
  0x95   :  { %12 = sbr.rel (!%p10_p7) target bundleno = 3 (0x3), region = 62 }

</bundles_post_ra>
